<compile_context>
chip_gen: v5e
topology: v5e:2x2
jax: 0.10.0
libtpu: 0.0.40
codegen_flags: <defaults>
</compile_context>

<pallas_src>
import jax
import jax.numpy as jnp
from jax.experimental import pallas as pl
from jax.experimental.pallas import tpu as pltpu


def _cdiv(a, b):
    return (a + b - 1) // b


def _round_up(a, b):
    return _cdiv(a, b) * b


def _make_kernel(c, has_alpha, needs_mask):
    """Build a kernel specialized (at trace time) on alpha / padding handling.

    Refs per grid step:
      x_ref:   (NB, C, TS)  logits block (native layout & dtype)
      t_ref:   (NB, 1, TS)  integer class targets (sentinel == C for padding)
      cls_ref: (1,  C, 1)   int32 class indices 0..C-1 (replaces a full iota)
      a_ref:   (1,  C, 1)   per-class alpha weights (only when has_alpha)
      acc_ref: (NB, 1, TS)  f32 partial sums, resident across spatial tiles
    """

    def kernel(x_ref, t_ref, cls_ref, *rest):
        if has_alpha:
            a_ref, acc_ref = rest
        else:
            (acc_ref,) = rest

        @pl.when(pl.program_id(1) == 0)
        def _init():
            acc_ref[...] = jnp.zeros_like(acc_ref)

        x = x_ref[...]                          # (NB, C, TS) native dtype
        t = t_ref[...].astype(jnp.int32)        # (NB, 1, TS)
        cls = cls_ref[...]                      # (1,  C, 1) int32

        # one-hot of the target along the class (sublane) axis via broadcast
        oh = cls == t                           # (NB, C, TS) bool

        # gather the raw target logit; max-stabilized logsumexp in f32
        xt = jnp.sum(jnp.where(oh, x, 0), axis=1, keepdims=True)
        m = jnp.max(x, axis=1, keepdims=True)
        p = jnp.exp((x - m).astype(jnp.float32))
        lse = jnp.log(jnp.sum(p, axis=1, keepdims=True))

        # -logpt = logsumexp(x) - x[target]
        nll = m.astype(jnp.float32) + lse - xt.astype(jnp.float32)

        if has_alpha:
            # alpha[target] via the same one-hot; sentinel target -> 0, so
            # padded columns / rows contribute exactly nothing.
            at = jnp.sum(jnp.where(oh, a_ref[...], 0.0), axis=1, keepdims=True)
            nll = nll * at
        elif needs_mask:
            # alpha-None fast path: only a cheap per-lane validity test on the
            # small target block, and only when padding actually exists.
            nll = jnp.where(t < c, nll, 0.0)

        acc_ref[...] += nll

    return kernel


def _choose_tiles(b, c, s, itemsize, block_bytes):
    """Pick (nb, n_b, tile_s, n_s) so the logits block is ~block_bytes."""
    # spatial (lane) tile: multiple of 128, capped at the 128-aligned extent
    tile_s = max(128, (block_bytes // max(1, c * itemsize)) // 128 * 128)
    tile_s = min(tile_s, _round_up(s, 128))
    n_s = _cdiv(s, tile_s)
    tile_s = _round_up(_cdiv(s, n_s), 128)        # rebalance to minimize padding
    # batch tile: fold several samples per grid step if one row-block is tiny
    blk = c * tile_s * itemsize
    nb = min(b, max(1, block_bytes // max(1, blk)))
    # v7x megacore: keep >= 2 batch tiles whenever there is > 1 sample so the
    # "parallel" axis has work for both TensorCores (no-op on v5e/v6e).
    if b > 1:
        nb = min(nb, _cdiv(b, 2))
    n_b = _cdiv(b, nb)
    nb = _cdiv(b, n_b)
    return nb, n_b, tile_s, n_s


def focal_loss(logits, target, gamma=0, alpha=None, size_average=True,
               block_bytes=8 * 1024 * 1024):
    """Pallas implementation of FocalLoss.forward.

    logits: (N, C) or (N, C, *spatial)  float array (NCHW-style)
    target: (N,)   or (N, *spatial)     integer class ids (any int dtype)
    alpha:  None, or per-class weights reshapeable to (C,)
    """
    del gamma  # the reference forward() never applies gamma

    x = logits
    if x.ndim > 2:
        b, c = int(x.shape[0]), int(x.shape[1])
        s = 1
        for d in x.shape[2:]:
            s *= int(d)
        xb = x.reshape(b, c, s)                          # free view, no transpose
        tb = target.reshape(b, 1, s)
    else:
        # plain (R, C) classification logits: put samples on the lane axis.
        # TODO(synk): this path pays one wrapper-side transpose; a sublane-
        # packed layout would avoid it (low priority for NCHW users).
        r, c = int(x.shape[0]), int(x.shape[1])
        xb = jnp.transpose(x, (1, 0)).reshape(1, c, r)
        tb = target.reshape(1, 1, r)
        b, s = 1, r
    n_valid = b * s

    # keep the caller's narrow integer target dtype (less HBM traffic); only
    # upcast if it's not an integer type or cannot hold the sentinel value C.
    if not jnp.issubdtype(tb.dtype, jnp.integer):
        tb = tb.astype(jnp.int32)
    elif jnp.iinfo(tb.dtype).max < c:
        tb = tb.astype(jnp.int32)

    cls = jnp.arange(c, dtype=jnp.int32).reshape(1, c, 1)

    # TODO(synk): the PyTorch module only accepts a per-class alpha tensor via
    # gather(0, target); scalar-alpha expansion is not part of this forward.
    has_alpha = alpha is not None
    if has_alpha:
        a = jnp.asarray(alpha, dtype=jnp.float32).reshape(1, c, 1)

    nb, n_b, tile_s, n_s = _choose_tiles(b, c, s, xb.dtype.itemsize, block_bytes)
    b_pad, s_pad = n_b * nb, n_s * tile_s
    padded = (b_pad != b) or (s_pad != s)
    if padded:
        xb = jnp.pad(xb, ((0, b_pad - b), (0, 0), (0, s_pad - s)))
        # sentinel class id == C: one-hot never matches.  NOTE: targets are
        # assumed in [0, C); out-of-range ids silently contribute like padding
        # (the PyTorch gather would error instead).
        tb = jnp.pad(tb, ((0, b_pad - b), (0, 0), (0, s_pad - s)),
                     constant_values=c)
    needs_mask = (not has_alpha) and padded

    kernel = _make_kernel(c, has_alpha, needs_mask)

    in_specs = [
        pl.BlockSpec((nb, c, tile_s), lambda n, si: (n, 0, si)),
        pl.BlockSpec((nb, 1, tile_s), lambda n, si: (n, 0, si)),
        pl.BlockSpec((1, c, 1), lambda n, si: (0, 0, 0)),
    ]
    args = [xb, tb, cls]
    if has_alpha:
        in_specs.append(pl.BlockSpec((1, c, 1), lambda n, si: (0, 0, 0)))
        args.append(a)

    partials = pl.pallas_call(
        kernel,
        out_shape=jax.ShapeDtypeStruct((b_pad, 1, tile_s), jnp.float32),
        grid_spec=pltpu.PrefetchScalarGridSpec(
            num_scalar_prefetch=0,
            grid=(n_b, n_s),
            in_specs=in_specs,
            out_specs=pl.BlockSpec((nb, 1, tile_s), lambda n, si: (n, 0, 0)),
        ),
        compiler_params=pltpu.CompilerParams(
            dimension_semantics=("parallel", "arbitrary"),
            vmem_limit_bytes=32 * 1024 * 1024,
        ),
    )(*args)

    total = jnp.sum(partials)
    if size_average:
        return total / jnp.float32(n_valid)
    return total


def _focal_loss_ref(logits, target, alpha=None, size_average=True):
    """Pure-JAX reference mirroring the PyTorch forward."""
    x = logits
    if x.ndim > 2:
        n, c = x.shape[0], x.shape[1]
        x = x.reshape(n, c, -1).transpose(0, 2, 1).reshape(-1, c)
    t = target.reshape(-1).astype(jnp.int32)
    logsm = jax.nn.log_softmax(x.astype(jnp.float32), axis=1)
    logpt = jnp.take_along_axis(logsm, t[:, None], axis=1)[:, 0]
    if alpha is not None:
        at = jnp.asarray(alpha, jnp.float32)[t]
        logpt = logpt * at
    loss = -logpt
    return loss.mean() if size_average else loss.sum()


if __name__ == "__main__":
    key = jax.random.PRNGKey(0)
    k1, k2, k3, k4, k5, k6 = jax.random.split(key, 6)

    # case 1: NCHW input, defaults (gamma=0, alpha=None, size_average=True)
    N, C, H, W = 2, 4, 16, 16
    logits = jax.random.normal(k1, (N, C, H, W), dtype=jnp.float32)
    target = jax.random.randint(k2, (N, H, W), 0, C, dtype=jnp.int32)
    out = jax.block_until_ready(focal_loss(logits, target))
    ref = _focal_loss_ref(logits, target)
    assert jnp.allclose(out, ref, rtol=1e-5, atol=1e-5), (out, ref)

    # case 2: per-class alpha weights + sum reduction
    alpha = jnp.array([0.25, 0.75, 0.5, 1.0], dtype=jnp.float32)
    out2 = jax.block_until_ready(
        focal_loss(logits, target, alpha=alpha, size_average=False))
    ref2 = _focal_loss_ref(logits, target, alpha=alpha, size_average=False)
    assert jnp.allclose(out2, ref2, rtol=1e-5, atol=1e-4), (out2, ref2)

    # case 3: non-128-aligned spatial extent (exercises sentinel padding + mask)
    logits3 = jax.random.normal(k3, (2, 4, 10, 10), dtype=jnp.float32)
    target3 = jax.random.randint(k4, (2, 10, 10), 0, 4, dtype=jnp.int32)
    out3 = jax.block_until_ready(focal_loss(logits3, target3))
    ref3 = _focal_loss_ref(logits3, target3)
    assert jnp.allclose(out3, ref3, rtol=1e-5, atol=1e-5), (out3, ref3)

    # case 4: plain (N, C) classification logits
    logits4 = jax.random.normal(k5, (8, 4), dtype=jnp.float32)
    target4 = jax.random.randint(k6, (8,), 0, 4, dtype=jnp.int32)
    out4 = jax.block_until_ready(focal_loss(logits4, target4))
    ref4 = _focal_loss_ref(logits4, target4)
    assert jnp.allclose(out4, ref4, rtol=1e-5, atol=1e-5), (out4, ref4)

    # case 5: tiny block_bytes forces a multi-tile grid (>=2 parallel batch
    # tiles + spatial accumulation across the "arbitrary" axis)
    logits5 = jax.random.normal(k1, (4, 4, 16, 16), dtype=jnp.float32)
    target5 = jax.random.randint(k2, (4, 16, 16), 0, 4, dtype=jnp.int32)
    out5 = jax.block_until_ready(focal_loss(logits5, target5, block_bytes=2048))
    ref5 = _focal_loss_ref(logits5, target5)
    assert jnp.allclose(out5, ref5, rtol=1e-5, atol=1e-5), (out5, ref5)

    # case 6: narrow (int16) targets are consumed directly (less HBM traffic)
    out6 = jax.block_until_ready(focal_loss(logits, target.astype(jnp.int16)))
    assert jnp.allclose(out6, ref, rtol=1e-5, atol=1e-5), (out6, ref)

    # case 7: bf16 logits take the native-dtype (denser vreg) path
    logits_bf = logits.astype(jnp.bfloat16)
    out7 = jax.block_until_ready(focal_loss(logits_bf, target))
    ref7 = _focal_loss_ref(logits_bf, target)
    assert jnp.allclose(out7, ref7, rtol=3e-2, atol=3e-2), (out7, ref7)

    print("KERNEL_OK")
</pallas_src>

<mosaic_0001>
module attributes {stable_mosaic.version = 11 : i64} {
  func.func @kernel(%arg0: i32, %arg1: i32, %arg2: memref<1x4x256xf32, #tpu.memory_space<vmem>>, %arg3: memref<1x1x256xi32, #tpu.memory_space<vmem>>, %arg4: memref<1x4x1xi32, #tpu.memory_space<vmem>>, %arg5: memref<1x1x256xf32, #tpu.memory_space<vmem>>) attributes {dimension_semantics = [#tpu.dimension_semantics<parallel>, #tpu.dimension_semantics<arbitrary>], iteration_bounds = array<i64: 2, 1>, scalar_prefetch = 0 : i64, scratch_operands = 0 : i64, tpu.core_type = #tpu.core_type<tc>, window_params = [{transform_indices = @transform_0, window_bounds = array<i64: 1, 4, 256>}, {transform_indices = @transform_1, window_bounds = array<i64: 1, 1, 256>}, {pipeline_mode = #tpu.pipeline_mode<synchronous>, transform_indices = @transform_2, window_bounds = array<i64: 1, 4, 1>}, {transform_indices = @transform_3, window_bounds = array<i64: 1, 1, 256>}]} {
    %c0_i32 = arith.constant 0 : i32
    %0 = arith.cmpi eq, %arg1, %c0_i32 : i32
    %1 = arith.extui %0 : i1 to i32
    %c0_i32_0 = arith.constant 0 : i32
    %2 = arith.cmpi ne, %1, %c0_i32_0 : i32
    scf.if %2 {
      %cst_18 = arith.constant 0.000000e+00 : f32
      %27 = vector.broadcast %cst_18 : f32 to vector<1x1x256xf32>
      %c0_19 = arith.constant 0 : index
      %c0_20 = arith.constant 0 : index
      %c0_21 = arith.constant 0 : index
      %28 = vector.load %arg5[%c0_19, %c0_20, %c0_21] : memref<1x1x256xf32, #tpu.memory_space<vmem>>, vector<1x1x256xf32>
      tpu.vector_store %arg5[%c0_19, %c0_20, %c0_21], %27 {strides = array<i32>} : memref<1x1x256xf32, #tpu.memory_space<vmem>>, vector<1x1x256xf32>,
    } else {
    }
    %c0 = arith.constant 0 : index
    %c0_1 = arith.constant 0 : index
    %c0_2 = arith.constant 0 : index
    %3 = vector.load %arg2[%c0, %c0_1, %c0_2] : memref<1x4x256xf32, #tpu.memory_space<vmem>>, vector<1x4x256xf32>
    %c0_3 = arith.constant 0 : index
    %c0_4 = arith.constant 0 : index
    %c0_5 = arith.constant 0 : index
    %4 = vector.load %arg3[%c0_3, %c0_4, %c0_5] : memref<1x1x256xi32, #tpu.memory_space<vmem>>, vector<1x1x256xi32>
    %c0_6 = arith.constant 0 : index
    %c0_7 = arith.constant 0 : index
    %c0_8 = arith.constant 0 : index
    %5 = vector.load %arg4[%c0_6, %c0_7, %c0_8] : memref<1x4x1xi32, #tpu.memory_space<vmem>>, vector<1x4x1xi32>
    %6 = vector.broadcast %5 : vector<1x4x1xi32> to vector<1x4x256xi32>
    %7 = vector.broadcast %4 : vector<1x1x256xi32> to vector<1x4x256xi32>
    %8 = arith.cmpi eq, %6, %7 : vector<1x4x256xi32>
    %c0_i32_9 = arith.constant 0 : i32
    %9 = arith.sitofp %c0_i32_9 : i32 to f32
    %10 = vector.broadcast %9 : f32 to vector<1x4x256xf32>
    %11 = arith.select %8, %3, %10 : vector<1x4x256xi1>, vector<1x4x256xf32>
    %cst = arith.constant dense<0.000000e+00> : vector<1x256xf32>
    %12 = vector.multi_reduction <add>, %11, %cst [1] : vector<1x4x256xf32> to vector<1x256xf32>
    %13 = vector.shape_cast %12 : vector<1x256xf32> to vector<1x1x256xf32>
    %cst_10 = arith.constant dense<0xFF800000> : vector<1x256xf32>
    %14 = vector.multi_reduction <maximumf>, %3, %cst_10 [1] : vector<1x4x256xf32> to vector<1x256xf32>
    %15 = vector.shape_cast %14 : vector<1x256xf32> to vector<1x1x256xf32>
    %16 = vector.broadcast %15 : vector<1x1x256xf32> to vector<1x4x256xf32>
    %17 = arith.subf %3, %16 : vector<1x4x256xf32>
    %18 = math.exp %17 : vector<1x4x256xf32>
    %cst_11 = arith.constant dense<0.000000e+00> : vector<1x256xf32>
    %19 = vector.multi_reduction <add>, %18, %cst_11 [1] : vector<1x4x256xf32> to vector<1x256xf32>
    %20 = vector.shape_cast %19 : vector<1x256xf32> to vector<1x1x256xf32>
    %21 = math.log %20 : vector<1x1x256xf32>
    %22 = arith.addf %15, %21 : vector<1x1x256xf32>
    %23 = arith.subf %22, %13 : vector<1x1x256xf32>
    %c0_12 = arith.constant 0 : index
    %c0_13 = arith.constant 0 : index
    %c0_14 = arith.constant 0 : index
    %24 = vector.load %arg5[%c0_12, %c0_13, %c0_14] : memref<1x1x256xf32, #tpu.memory_space<vmem>>, vector<1x1x256xf32>
    %25 = arith.addf %24, %23 : vector<1x1x256xf32>
    %c0_15 = arith.constant 0 : index
    %c0_16 = arith.constant 0 : index
    %c0_17 = arith.constant 0 : index
    %26 = vector.load %arg5[%c0_15, %c0_16, %c0_17] : memref<1x1x256xf32, #tpu.memory_space<vmem>>, vector<1x1x256xf32>
    tpu.vector_store %arg5[%c0_15, %c0_16, %c0_17], %25 {strides = array<i32>} : memref<1x1x256xf32, #tpu.memory_space<vmem>>, vector<1x1x256xf32>,
    return
  }
  func.func @transform_0(%arg0: i32, %arg1: i32) -> (i32, i32, i32) {
    %c0_i32 = arith.constant 0 : i32
    %c0_i32_0 = arith.constant 0 : i32
    return %arg0, %c0_i32, %arg1 : i32, i32, i32
  }
  func.func @transform_1(%arg0: i32, %arg1: i32) -> (i32, i32, i32) {
    %c0_i32 = arith.constant 0 : i32
    %c0_i32_0 = arith.constant 0 : i32
    return %arg0, %c0_i32, %arg1 : i32, i32, i32
  }
  func.func @transform_2(%arg0: i32, %arg1: i32) -> (i32, i32, i32) {
    %c0_i32 = arith.constant 0 : i32
    %c0_i32_0 = arith.constant 0 : i32
    %c0_i32_1 = arith.constant 0 : i32
    %c0_i32_2 = arith.constant 0 : i32
    return %c0_i32, %c0_i32_0, %c0_i32_1 : i32, i32, i32
  }
  func.func @transform_3(%arg0: i32, %arg1: i32) -> (i32, i32, i32) {
    %c0_i32 = arith.constant 0 : i32
    %c0_i32_0 = arith.constant 0 : i32
    %c0_i32_1 = arith.constant 0 : i32
    return %arg0, %c0_i32, %c0_i32_0 : i32, i32, i32
  }
}

</mosaic_0001>

<bundles_post_ra>
// kernel: tpu_custom_call.1
= control target key start
LH: loop header
LB: loop body
LE: loop exit
PB: predicated region body
PF: predicated region fallthrough
CT: control target
= control target key end

     0   :  { %8 = vsyncpa [#allocation3], 0  ;;  %s844_s0 = inlined_call_operand.hbm [shape: f32[2,4,256], index: 0, kind: input, shape index: {}]   ;;  %s845_s1 = inlined_call_operand.vmem [shape: s32[2,1,256], index: 1, kind: input, shape index: {}]   ;;  %s846_s2 = inlined_call_operand.vmem [shape: s32[1,4,1], index: 2, kind: input, shape index: {}]   ;;  %s847_s3 = inlined_call_operand.hbm [shape: f32[2,1,256], index: 3, kind: output, shape index: {}]  }
   0x1   :  { %10 = vsyncpa [#allocation3 + $0x1], 0 }
   0x2   :  { %11 = vsyncpa [#allocation4], 0 }
   0x3   :  { %13 = vsyncpa [#allocation4 + $0x1], 0  ;;  %s684_s12 = smov 0   ;;  %s686_s13 = smov 0  }
   0x4   :  { %s688_s14 = smov 0   ;;  %s690_s15 = smov 0  }
   0x5   :  { %s692_s16 = smov 0   ;;  %s694_s17 = smov 0  }
   0x6 LB: > { %s461_s18 = sadd.s32 4294967295, %s660_s17   ;;  %s462_s19 = sadd.s32 4294967294, %s660_s17   ;;  %s660_s17 = sphi %s694_s17, %s19_s17   ;;  %s656_s16 = sphi %s692_s16, %s858_s16   ;;  %s652_s15 = sphi %s690_s15, %s857_s15   ;;  %s648_s14 = sphi %s688_s14, %s856_s14   ;;  %s644_s13 = sphi %s686_s13, %s855_s13   ;;  %s640_s12 = sphi %s684_s12, %s854_s12  }
   0x7   : > { %s31_s20 = sadd.s32 1, %s656_s16  ;;  %s40_s21 = sadd.s32 1, %s648_s14 }
   0x8   : > { %p33_p0 = scmp.ge.s32.totalorder %s31_s20, 2  ;;  %p47_p1 = scmp.ne.s32.totalorder %s648_s14, %s644_s13 }
   0x9   : > { %p48_p2 = scmp.eq.s32.totalorder %s660_s17, 0  ;;  %p53_p3 = scmp.ne.s32.totalorder %s644_s13, %s640_s12 }
   0xa   : > { %s860_s20 = smov (%p33_p0, %s31_s20), 0  ;;  %p54_p5 = scmp.eq.s32.totalorder %s461_s18, 0 }
   0xb   : > { %p725_p4 = por %p48_p2, %p47_p1  ;;  %s35_s23 = ssub.s32 %s656_s16, %s860_s20 }
   0xc   : > { %p126_p6 = scmp.eq.s32.totalorder %s461_s18, 1  ;;  %p38_p7 = scmp.eq.s32.totalorder %s35_s23, 0 }
   0xd   : > { %p731_p8 = por %p54_p5, %p53_p3  ;;  %p132_p10 = scmp.eq.s32.totalorder %s462_s19, 1 }
   0xe   : > { %p735_p9 = por %p126_p6, %p47_p1  ;;  %p464_p12 = scmp.ge.s32.totalorder %s660_s17, 2 }
   0xf   : > { %s740_s26 = scalar_select %p38_p7, %s648_s14, %s40_s21  }
  0x10   : > { %p742_p11 = por %p132_p10, %p53_p3  ;;  %p489_p13 = scmp.lt.s32.totalorder %s660_s17, 2 }
  0x11   : > { %s155_s28 = sand.u32 1, %s648_s14   ;;  %s476_s30 = sshll.u32 %s656_s16, 3 }
  0x12   : > { %s465_s29 = sshll.u32 %s155_s28, 3  ;;  %s166_s6 = scalar_lea.hbm %s844_s0, %s476_s30 }
  0x13   : > { %s159_s7 = scalar_lea.vmem [#allocation2], %s465_s29  ;;  %s168_s9 = sshll.u32 %s166_s6, 4  ;;  %s169_s9 = int_to_ptr.hbm [resolvable:$true] %s168_s9 }
  0x14   : > { %s170_s8 = sshll.u32 %s159_s7, 4  ;;  %p482_p0 = pnand %p489_p13, %p725_p4  ;;  %s171_s8 = int_to_ptr.vmem [resolvable:$true] %s170_s8 }
  0x15   : > { %p468_p1 = scmp.ge.s32.totalorder %s660_s17, 1  ;;  %p187_p2 = scmp.lt.s32.totalorder %s660_s17, 3 }
  0x16   : > { %s156_s10 = scalar_lea.sflag [#allocation3], %s155_s28 }
  0x17   : > { %484 = dma.hbm_to_vmem [thread:$0]  (!%p482_p0), %s169_s9, 128, %s171_s8, %s156_s10  }
  0x18   : > { %p188_p3 = pnand %p468_p1, %p187_p2 }
  0x19   : > { %s758_s11 = sand.u32 (!%p188_p3), 1, %s644_s13  }
  0x1a   : > { %191 = sbr.rel (%p188_p3) target bundleno = 174 (0xae), region = 32  ;;  %s469_s18 = sshll.u32 (!%p188_p3), %s758_s11, 3 }
  0x1b   : > { %s194_s19 = scalar_lea.sflag (!%p188_p3), [#allocation3], %s758_s11  ;;  %s197_s21 = scalar_lea.vmem (!%p188_p3), [#allocation2], %s469_s18 }
  0x1f   : > { %631 = dma.done.wait (%p731_p8), %s194_s19, 128  }
  0x20   : > { %633 = vsyncadd (%p731_p8), %s194_s19, 4294967168  ;;  %v662_v0 = vmov 0   ;;  %v250_v1 = vld [vmem:[%s846_s2] sm:$0xf]  ;;  %v248_v2 = vld [vmem:[%s197_s21] sm:$0xff]  ;;  %vm266_vm0 = vcmask 1043456   ;;  %v243_v32 = vlaneseq }
  0x21   : > { %541 = vset.pattern.permute.xlu0 %v662_v0  ;;  %259 = vst [vmem:[#allocation1] ss:$2 sm:$0xff] %v248_v2  ;;  %s470_s24 = sshll.u32 %s758_s11, 1  ;;  %p231_p4 = scmp.lt.s32.totalorder %s652_s15, 1  ;;  %v663_v36 = vmov 0.0   ;;  %vm340_vm4 = vcmask 1040384  }
  0x22   : > { %252 = vperm.xlu0 %541, %v250_v1   ;;  %vm783_vm1 = vcmp.lt.s32.totalorder %v243_v32, 256  ;;  %s787_s28 = scalar_lea.vmem [#allocation5], %s470_s24  ;;  %s473_s7 = sshll.u32 %s652_s15, 1 }
  0x23   : > { %247 = vst.msk [vmem:[%s787_s28] sm:$0x3] %vm783_vm1, %v663_v36  ;;  %s232_s29 = scalar_select %p231_p4, %s652_s15, 1 }
  0x24   : > { %s360_s10 = scalar_lea.hbm %s847_s3, %s473_s7  ;;  %s362_s18 = sshll.u32 %s787_s28, 4  ;;  %s363_s18 = int_to_ptr.vmem [resolvable:$true] %s362_s18 }
  0x25   : > { %s471_s30 = sshll.u32 %s232_s29, 1  ;;  %s364_s19 = sshll.u32 %s360_s10, 4  ;;  %s365_s19 = int_to_ptr.hbm [resolvable:$true] %s364_s19 }
  0x26   : > { %s237_s6 = scalar_lea.vmem %s845_s1, %s471_s30  ;;  %s350_s15 = scalar_lea.sflag [#allocation4], %s758_s11 }
  0x27   : > { %v249_v43 = vld [vmem:[%s237_s6] sm:$0x3]  ;;  %s592_s21 = sshra.s32 %s365_s19, 4  ;;  %s598_s29 = scalar_lea.hbm %s847_s3, 4  ;;  %s593_s21 = int_to_ptr.hbm [resolvable:$true] %s592_s21 }
  0x28   : > { %v769_v3 = vld.sshfl [vmem:[#allocation1] sm:$0xff pattern:$0x75316420]  ;;  %v771_v4 = vld.sshfl [vmem:[#allocation1 + $0x8] sm:$0xff pattern:$0x75316420]  ;;  %p599_p8 = scmp.lt.s32.totalorder %s593_s21, %s847_s3 }
  0x29   : > { %281 = vst [vmem:[#allocation1] ss:$2 sm:$0xff] %v248_v2  ;;  %v254_v45 = vperm.slane %v249_v43, 0  ;;  %v255_v46 = vperm.slane %v249_v43, 1  ;;  %s594_s22 = scalar_lea.hbm %s593_s21, 2 }
  0x2a   : > { %p595_p5 = scmp.ne.s32.totalorder %s593_s21, %s594_s22  ;;  %p600_p10 = scmp.lt.s32.totalorder %s598_s29, %s594_s22 }
  0x2c   : > { %p596_p6 = pnand %p595_p5, %p735_p9  ;;  %p601_p13 = por %p600_p10, %p599_p8 }
  0x2e   : > { %p597_p7 = pneg %p596_p6 }
  0x30   : > { %v283_v5 = vld.sshfl [vmem:[#allocation1 + $0x8] sm:$0xff pattern:$0x75316420]  ;;  %v282_v7 = vld.sshfl [vmem:[#allocation1] sm:$0xff pattern:$0x75316420]  ;;  %p602_p0 = pnand %p601_p13, %p597_p7 }
  0x31   : > { %v293_v6 = vsel %vm266_vm0, %v283_v5, -inf  ;;  %v286_v9 = vsel %vm266_vm0, %v282_v7, -inf }
  0x32   : > { %v294_v8 = vrot.slane %v293_v6, 4  ;;  %v287_v10 = vrot.slane %v286_v9, 4 }
  0x34   : > { %v295_v11 = vmax.f32 %v293_v6, %v294_v8  ;;  %v288_v12 = vmax.f32 %v286_v9, %v287_v10  ;;  %v336_v10 = vld [vmem:[%s787_s28] sm:$0x3] }
  0x36   : > { %v296_v13 = vrot.slane %v295_v11, 2  ;;  %v289_v14 = vrot.slane %v288_v12, 2 }
  0x38   : > { %v297_v15 = vmax.f32 %v295_v11, %v296_v13  ;;  %v290_v16 = vmax.f32 %v288_v12, %v289_v14 }
  0x3a   : > { %v298_v17 = vrot.slane %v297_v15, 1  ;;  %v291_v18 = vrot.slane %v290_v16, 1 }
  0x3c   : > { %v299_v19 = vmax.f32 %v297_v15, %v298_v17  ;;  %v775_v20 = vmax.f32 %v290_v16, %v291_v18 }
  0x3e   : > { %v302_v21 = vrot.slane %v299_v19, 4 }
  0x40   : > { %v303_v22 = vsel %vm266_vm0, %v775_v20, %v302_v21 }
  0x41   : > { %v305_v23 = vsub.f32 %v248_v2, %v303_v22 }
  0x43   : > { %v306_v24 = vmul.f32 1.442695, %v305_v23 }
  0x45   : > { %542 = vpow2.f32 %v306_v24 }
  0x4b   : > { %v543_v25 = vpop.eup %542 }
  0x4c   : > { %309 = vst [vmem:[#allocation1] ss:$2 sm:$0xff] %v543_v25 }
  0x53   : > { %v311_v26 = vld.sshfl [vmem:[#allocation1 + $0x8] sm:$0xff pattern:$0x75316420]  ;;  %v310_v27 = vld.sshfl [vmem:[#allocation1] sm:$0xff pattern:$0x75316420] }
  0x54   : > { %v321_v28 = vsel %vm266_vm0, %v311_v26, 0.0  ;;  %v314_v29 = vsel %vm266_vm0, %v310_v27, 0.0 }
  0x55   : > { %v322_v30 = vrot.slane %v321_v28, 4  ;;  %v315_v31 = vrot.slane %v314_v29, 4 }
  0x57   : > { %v323_v33 = vadd.f32 %v322_v30, %v321_v28  ;;  %v316_v35 = vadd.f32 %v315_v31, %v314_v29 }
  0x59   : > { %v324_v37 = vrot.slane %v323_v33, 2  ;;  %v317_v38 = vrot.slane %v316_v35, 2 }
  0x5b   : > { %v325_v39 = vadd.f32 %v324_v37, %v323_v33  ;;  %v318_v40 = vadd.f32 %v317_v38, %v316_v35 }
  0x5d   : > { %v326_v41 = vrot.slane %v325_v39, 1  ;;  %v319_v42 = vrot.slane %v318_v40, 1 }
  0x5f   : > { %v327_v44 = vadd.f32 %v326_v41, %v325_v39  ;;  %v320_v47 = vadd.f32 %v319_v42, %v318_v40 }
  0x61   : > { %544 = vlog2.f32 %v327_v44 }
  0x62   : > { %546 = vlog2.f32 %v320_v47 }
  0x67   : > { %v545_v55 = vpop.eup %544 }
  0x68   : > { %v547_v58 = vpop.eup %546  ;;  %v331_v61 = vmul.f32 0.6931472, %v545_v55 }
  0x69   : > { %v329_v0 = vmul.f32 0.6931472, %v547_v58 }
  0x6b   : > { %v332_v6 = vadd.f32 %v329_v0, %v775_v20 }
  0x94   : > { %v253_v48 = vpop.permute.xlu0 %252 }
  0x95   : > { %vm256_vm2 = vcmp.eq.s32.totalorder %v253_v48, %v254_v45  ;;  %vm257_vm3 = vcmp.eq.s32.totalorder %v253_v48, %v255_v46 }
  0x96   : > { %v264_v49 = vsel %vm256_vm2, %v769_v3, 0.0  ;;  %v265_v50 = vsel %vm257_vm3, %v771_v4, 0.0  ;;  %v333_v3 = vadd.f32 %v331_v61, %v299_v19 }
  0x97   : > { %v267_v51 = vsel %vm266_vm0, %v264_v49, 0.0  ;;  %v274_v52 = vsel %vm266_vm0, %v265_v50, 0.0 }
  0x98   : > { %v268_v53 = vrot.slane %v267_v51, 4  ;;  %v275_v54 = vrot.slane %v274_v52, 4 }
  0x9a   : > { %v269_v56 = vadd.f32 %v268_v53, %v267_v51  ;;  %v276_v57 = vadd.f32 %v275_v54, %v274_v52 }
  0x9c   : > { %v270_v59 = vrot.slane %v269_v56, 2  ;;  %v277_v60 = vrot.slane %v276_v57, 2 }
  0x9e   : > { %v271_v62 = vadd.f32 %v270_v59, %v269_v56  ;;  %v278_v63 = vadd.f32 %v277_v60, %v276_v57 }
  0xa0   : > { %v272_v1 = vrot.slane %v271_v62, 1  ;;  %v279_v2 = vrot.slane %v278_v63, 1 }
  0xa2   : > { %v273_v4 = vadd.f32 %v272_v1, %v271_v62  ;;  %v280_v5 = vadd.f32 %v279_v2, %v278_v63 }
  0xa4   : > { %v335_v7 = vsub.f32 %v333_v3, %v280_v5  ;;  %v334_v8 = vsub.f32 %v332_v6, %v273_v4 }
  0xa6   : > { %v339_v9 = vrot.slane %v335_v7, 7 }
  0xa8   : > { %v341_v11 = vsel %vm340_vm4, %v334_v8, %v339_v9 }
  0xa9   : > { %v343_v12 = vadd.f32 %v341_v11, %v336_v10 }
  0xab   : > { %348 = vst.msk [vmem:[%s787_s28] sm:$0x3] %vm783_vm1, %v343_v12 }
  0xac   : > { %605 = shalt.err (!%p602_p0)
}
  0xad   : > { %479 = dma.vmem_to_hbm [thread:$0]  (%p735_p9), %s363_s18, 32, %s365_s19, %s350_s15  }
  0xae PF: > { %s376_s11 = sand.u32 1, %s640_s12   ;;  %p486_p1 = pnand %p464_p12, %p742_p11 }
  0xaf   : > { %s377_s28 = scalar_lea.sflag [#allocation4], %s376_s11 }
  0xb0   : > { %p487_p2 = pneg %p486_p1 }
  0xb2   : > { %635 = dma.done.wait (%p487_p2), %s377_s28, 32  }
  0xb3   : > { %637 = vsyncadd (%p487_p2), %s377_s28, 4294967264  ;;  %s19_s17 = sadd.s32 1, %s660_s17   ;;  %s854_s12 = smov %s644_s13 }
  0xb4   : > { %p16_p3 = scmp.ge.s32.totalorder %s19_s17, 4   ;;  %s855_s13 = smov %s648_s14 }
  0xb5   : > { %s856_s14 = smov %s740_s26  ;;  %s857_s15 = smov %s656_s16 }
  0xb6   : > { %s858_s16 = smov %s860_s20  ;;  %18 = sbr.rel (!%p16_p3) target bundleno = 6 (0x6), region = 84 }
  0xbb   :  { %383 = vsyncpa [#allocation3], 1 }
  0xbc   :  { %385 = vsyncpa [#allocation3 + $0x1], 1 }
  0xbd   :  { %386 = vsyncpa [#allocation4], 1 }
  0xbe   :  { %388 = vsyncpa [#allocation4 + $0x1], 1 }

</bundles_post_ra>
